<compile_context>
chip_gen: v5e
topology: v5e:2x2
jax: 0.10.0
libtpu: 0.0.40
codegen_flags: <defaults>
</compile_context>

<pallas_src>
import functools

import jax
import jax.numpy as jnp
from jax.experimental import pallas as pl
from jax.experimental.pallas import tpu as pltpu

LANES = 128


def _round_up(x, m):
    return (x + m - 1) // m * m


def _reduce_rows_to_vreg(v):
    """(R, 128) f32 -> (8, 128) partial sums. R % 8 == 0.

    Only aligned static slices + vreg-wise adds (pure VALU work, no XLU)."""
    acc = v[0:8]
    for s in range(8, v.shape[0], 8):
        acc = acc + v[s:s + 8]
    return acc


def _dice_bce_kernel(x_ref, t_ref, out_ref, acc_ref, *, n_elems, padded):
    """x_ref/t_ref: (TILE_ROWS, 128) tiles of logits / targets (native dtype).

    out_ref: (1, 4, 128) per-split per-lane sums:
       [0]: sum(p * t)  (intersection)   [1]: sum(p)
       [2]: sum(t)                       [3]: sum(bce terms)
    acc_ref: (4, 8, 128) f32 running accumulators (VMEM scratch).
    """
    c = pl.program_id(0)          # split ("parallel" axis, one per TC on v7x)
    i = pl.program_id(1)          # reduction step ("arbitrary" axis)
    ni = pl.num_programs(1)
    tile_rows = x_ref.shape[0]

    @pl.when(i == 0)
    def _():
        acc_ref[...] = jnp.zeros_like(acc_ref)

    x = x_ref[...].astype(jnp.float32)
    t = t_ref[...].astype(jnp.float32)

    # p = sigmoid(x); BCE shares the transcendentals:
    #   log(p)     = -log(1 + exp(-x))
    #   log(1 - p) = -x - log(1 + exp(-x))
    # Both clamped at -100 to match torch.nn.functional.binary_cross_entropy.
    e = jnp.exp(-x)
    one_plus_e = 1.0 + e
    p = pl.reciprocal(one_plus_e, approx=True)
    l = jnp.log(one_plus_e)
    log_p = jnp.maximum(-l, -100.0)
    log_1mp = jnp.maximum(-x - l, -100.0)
    # For x < ~-88, exp(-x) overflows; torch's (1 - sigmoid(x)) == 1 there -> log = 0.
    log_1mp = jnp.where(x < -88.0, 0.0, log_1mp)
    bce = -(t * log_p + (1.0 - t) * log_1mp)
    pt = p * t

    def _accumulate(pt_, p_, t_, bce_):
        acc_ref[0] += _reduce_rows_to_vreg(pt_)
        acc_ref[1] += _reduce_rows_to_vreg(p_)
        acc_ref[2] += _reduce_rows_to_vreg(t_)
        acc_ref[3] += _reduce_rows_to_vreg(bce_)

    if padded:  # static: mask code only exists when the slab has padding
        block = c * ni + i                        # global block index
        start = block * (tile_rows * LANES)       # first flat element of block
        needs_mask = start + tile_rows * LANES > n_elems

        @pl.when(jnp.logical_not(needs_mask))
        def _():
            _accumulate(pt, p, t, bce)

        @pl.when(needs_mask)
        def _():
            row = jax.lax.broadcasted_iota(jnp.int32, (tile_rows, LANES), 0)
            lane = jax.lax.broadcasted_iota(jnp.int32, (tile_rows, LANES), 1)
            idx = start + row * LANES + lane
            m = (idx < n_elems).astype(jnp.float32)
            _accumulate(pt * m, p * m, t * m, bce * m)
    else:
        _accumulate(pt, p, t, bce)

    @pl.when(i == ni - 1)
    def _():
        # one small cross-sublane reduce per split: (4, 8, 128) -> (4, 128)
        out_ref[0] = jnp.stack(
            [jnp.sum(acc_ref[k], axis=0) for k in range(4)], axis=0)


@functools.partial(jax.jit, static_argnames=("smooth", "tile_rows", "splits"))
def dice_bce_loss(inputs, targets, smooth=1.0, tile_rows=1024, splits=2):
    xf = inputs.reshape(-1)     # native dtype over the wire; cast in-kernel
    tf = targets.reshape(-1)
    n = xf.shape[0]

    # Sublane multiple so packed (bf16/int8) tiles stay layout-legal.
    def sub_mult(dt):
        return 8 * max(1, 4 // jnp.dtype(dt).itemsize)

    mult = max(sub_mult(xf.dtype), sub_mult(tf.dtype))
    max_tile = _round_up(max(int(tile_rows), mult), mult)

    rows = pl.cdiv(n, LANES)
    chunks = max(splits, pl.cdiv(rows, max_tile))   # total number of blocks
    chunks = _round_up(chunks, splits)              # evenly divisible per split
    tr = _round_up(pl.cdiv(rows, chunks), mult)     # actual tile rows <= max_tile
    steps_per_split = chunks // splits
    rows_pad = chunks * tr
    pad = rows_pad * LANES - n

    if pad:  # static branch: aligned inputs get a free reshape, no pad copy
        xf = jnp.pad(xf, (0, pad))
        tf = jnp.pad(tf, (0, pad))
    xp = xf.reshape(rows_pad, LANES)
    tp = tf.reshape(rows_pad, LANES)

    in_spec = pl.BlockSpec((tr, LANES), lambda c, i: (c * steps_per_split + i, 0))
    out_spec = pl.BlockSpec((1, 4, LANES), lambda c, i: (c, 0, 0))

    partials = pl.pallas_call(
        functools.partial(_dice_bce_kernel, n_elems=n, padded=pad > 0),
        out_shape=jax.ShapeDtypeStruct((splits, 4, LANES), jnp.float32),
        grid_spec=pltpu.PrefetchScalarGridSpec(
            num_scalar_prefetch=0,
            grid=(splits, steps_per_split),
            in_specs=[in_spec, in_spec],
            out_specs=out_spec,
            scratch_shapes=[pltpu.VMEM((4, 8, LANES), jnp.float32)],
        ),
        compiler_params=pltpu.CompilerParams(
            # leading axis parallel -> both TensorCores on v7x; reduction last.
            dimension_semantics=("parallel", "arbitrary"),
        ),
    )(xp, tp)

    sums = jnp.sum(partials, axis=(0, 2))  # tiny glue: (splits, 4, 128) -> (4,)
    intersection, sum_p, sum_t, bce_sum = sums[0], sums[1], sums[2], sums[3]

    bce = bce_sum / jnp.float32(n)
    dice_loss = 1.0 - (2.0 * intersection + smooth) / (sum_p + sum_t + smooth)
    return bce + dice_loss


def _reference(inputs, targets, smooth=1.0):
    # Faithful to torch: sigmoid, then BCE with logs clamped at -100.
    p = jax.nn.sigmoid(inputs.reshape(-1).astype(jnp.float32))
    t = targets.reshape(-1).astype(jnp.float32)
    intersection = jnp.sum(p * t)
    dice = 1.0 - (2.0 * intersection + smooth) / (jnp.sum(p) + jnp.sum(t) + smooth)
    log_p = jnp.maximum(jnp.log(p), -100.0)
    log_1mp = jnp.maximum(jnp.log(1.0 - p), -100.0)
    bce = jnp.mean(-(t * log_p + (1.0 - t) * log_1mp))
    return bce + dice


if __name__ == "__main__":
    key = jax.random.PRNGKey(0)
    k1, k2, k3, k4 = jax.random.split(key, 4)

    # Typical segmentation setup: logits + binary targets, NCHW (lane-aligned,
    # so the wrapper does no padding at all).
    x = jax.random.normal(k1, (2, 4, 16, 16), dtype=jnp.float32)
    t = (jax.random.uniform(k2, (2, 4, 16, 16)) > 0.5).astype(jnp.float32)
    loss = jax.block_until_ready(dice_bce_loss(x, t, smooth=1.0))
    ref = _reference(x, t, smooth=1.0)
    # Tolerance covers the approx-reciprocal sigmoid used for the dice sums.
    assert jnp.allclose(loss, ref, atol=2e-3, rtol=2e-3), (loss, ref)

    # Ragged, non-aligned shape in bf16: exercises the in-kernel tail mask and
    # the native-narrow-dtype path.
    x2 = jax.random.normal(k3, (3, 5, 17, 13), dtype=jnp.bfloat16)
    t2 = (jax.random.uniform(k4, (3, 5, 17, 13)) > 0.5).astype(jnp.bfloat16)
    loss2 = jax.block_until_ready(dice_bce_loss(x2, t2, smooth=1.0))
    ref2 = _reference(x2, t2, smooth=1.0)
    assert jnp.allclose(loss2, ref2, atol=2e-3, rtol=2e-3), (loss2, ref2)

    print("KERNEL_OK")
</pallas_src>

<mosaic_0001>
module attributes {stable_mosaic.version = 11 : i64} {
  func.func @_dice_bce_kernel(%arg0: i32, %arg1: i32, %arg2: memref<8x128xf32, #tpu.memory_space<vmem>>, %arg3: memref<8x128xf32, #tpu.memory_space<vmem>>, %arg4: memref<1x4x128xf32, #tpu.memory_space<vmem>>, %arg5: memref<4x8x128xf32, #tpu.memory_space<vmem>>) attributes {dimension_semantics = [#tpu.dimension_semantics<parallel>, #tpu.dimension_semantics<arbitrary>], iteration_bounds = array<i64: 2, 1>, scalar_prefetch = 0 : i64, scratch_operands = 1 : i64, tpu.core_type = #tpu.core_type<tc>, window_params = [{transform_indices = @transform_0, window_bounds = array<i64: 8, 128>}, {transform_indices = @transform_1, window_bounds = array<i64: 8, 128>}, {transform_indices = @transform_2, window_bounds = array<i64: 1, 4, 128>}]} {
    %c0_i32 = arith.constant 0 : i32
    %0 = arith.cmpi eq, %arg1, %c0_i32 : i32
    %1 = arith.extui %0 : i1 to i32
    %c0_i32_0 = arith.constant 0 : i32
    %2 = arith.cmpi ne, %1, %c0_i32_0 : i32
    scf.if %2 {
      %cst_36 = arith.constant 0.000000e+00 : f32
      %60 = vector.broadcast %cst_36 : f32 to vector<4x8x128xf32>
      %c0_37 = arith.constant 0 : index
      %c0_38 = arith.constant 0 : index
      %c0_39 = arith.constant 0 : index
      %61 = vector.load %arg5[%c0_37, %c0_38, %c0_39] : memref<4x8x128xf32, #tpu.memory_space<vmem>>, vector<4x8x128xf32>
      tpu.vector_store %arg5[%c0_37, %c0_38, %c0_39], %60 {strides = array<i32>} : memref<4x8x128xf32, #tpu.memory_space<vmem>>, vector<4x8x128xf32>,
    } else {
    }
    %c0 = arith.constant 0 : index
    %c0_1 = arith.constant 0 : index
    %3 = vector.load %arg2[%c0, %c0_1] : memref<8x128xf32, #tpu.memory_space<vmem>>, vector<8x128xf32>
    %c0_2 = arith.constant 0 : index
    %c0_3 = arith.constant 0 : index
    %4 = vector.load %arg3[%c0_2, %c0_3] : memref<8x128xf32, #tpu.memory_space<vmem>>, vector<8x128xf32>
    %cst = arith.constant 0.000000e+00 : f32
    %5 = vector.broadcast %cst : f32 to vector<8x128xf32>
    %6 = arith.subf %5, %3 : vector<8x128xf32>
    %7 = math.exp %6 : vector<8x128xf32>
    %cst_4 = arith.constant 1.000000e+00 : f32
    %8 = vector.broadcast %cst_4 : f32 to vector<8x128xf32>
    %9 = arith.addf %8, %7 : vector<8x128xf32>
    %10 = tpu.reciprocal %9 {approx = true} : vector<8x128xf32> -> vector<8x128xf32>
    %11 = math.log %9 : vector<8x128xf32>
    %cst_5 = arith.constant 0.000000e+00 : f32
    %12 = vector.broadcast %cst_5 : f32 to vector<8x128xf32>
    %13 = arith.subf %12, %11 : vector<8x128xf32>
    %cst_6 = arith.constant -1.000000e+02 : f32
    %14 = vector.broadcast %cst_6 : f32 to vector<8x128xf32>
    %15 = arith.maximumf %13, %14 : vector<8x128xf32>
    %cst_7 = arith.constant 0.000000e+00 : f32
    %16 = vector.broadcast %cst_7 : f32 to vector<8x128xf32>
    %17 = arith.subf %16, %3 : vector<8x128xf32>
    %18 = arith.subf %17, %11 : vector<8x128xf32>
    %cst_8 = arith.constant -1.000000e+02 : f32
    %19 = vector.broadcast %cst_8 : f32 to vector<8x128xf32>
    %20 = arith.maximumf %18, %19 : vector<8x128xf32>
    %cst_9 = arith.constant -8.800000e+01 : f32
    %21 = vector.broadcast %cst_9 : f32 to vector<8x128xf32>
    %22 = arith.cmpf olt, %3, %21 : vector<8x128xf32>
    %cst_10 = arith.constant 0.000000e+00 : f32
    %23 = vector.broadcast %cst_10 : f32 to vector<8x128xf32>
    %24 = arith.select %22, %23, %20 : vector<8x128xi1>, vector<8x128xf32>
    %25 = arith.mulf %4, %15 : vector<8x128xf32>
    %cst_11 = arith.constant 1.000000e+00 : f32
    %26 = vector.broadcast %cst_11 : f32 to vector<8x128xf32>
    %27 = arith.subf %26, %4 : vector<8x128xf32>
    %28 = arith.mulf %27, %24 : vector<8x128xf32>
    %29 = arith.addf %25, %28 : vector<8x128xf32>
    %cst_12 = arith.constant 0.000000e+00 : f32
    %30 = vector.broadcast %cst_12 : f32 to vector<8x128xf32>
    %31 = arith.subf %30, %29 : vector<8x128xf32>
    %32 = arith.mulf %10, %4 : vector<8x128xf32>
    %c0_13 = arith.constant 0 : index
    %c0_14 = arith.constant 0 : index
    %c0_15 = arith.constant 0 : index
    %33 = vector.load %arg5[%c0_13, %c0_14, %c0_15] : memref<4x8x128xf32, #tpu.memory_space<vmem>>, vector<1x8x128xf32>
    %34 = vector.shape_cast %33 : vector<1x8x128xf32> to vector<8x128xf32>
    %35 = arith.addf %34, %32 : vector<8x128xf32>
    %c0_16 = arith.constant 0 : index
    %c0_17 = arith.constant 0 : index
    %c0_18 = arith.constant 0 : index
    %36 = vector.load %arg5[%c0_16, %c0_17, %c0_18] : memref<4x8x128xf32, #tpu.memory_space<vmem>>, vector<1x8x128xf32>
    %37 = vector.shape_cast %36 : vector<1x8x128xf32> to vector<8x128xf32>
    %38 = vector.shape_cast %35 : vector<8x128xf32> to vector<1x8x128xf32>
    tpu.vector_store %arg5[%c0_16, %c0_17, %c0_18], %38 {strides = array<i32>} : memref<4x8x128xf32, #tpu.memory_space<vmem>>, vector<1x8x128xf32>,
    %c1 = arith.constant 1 : index
    %c0_19 = arith.constant 0 : index
    %c0_20 = arith.constant 0 : index
    %39 = vector.load %arg5[%c1, %c0_19, %c0_20] : memref<4x8x128xf32, #tpu.memory_space<vmem>>, vector<1x8x128xf32>
    %40 = vector.shape_cast %39 : vector<1x8x128xf32> to vector<8x128xf32>
    %41 = arith.addf %40, %10 : vector<8x128xf32>
    %c1_21 = arith.constant 1 : index
    %c0_22 = arith.constant 0 : index
    %c0_23 = arith.constant 0 : index
    %42 = vector.load %arg5[%c1_21, %c0_22, %c0_23] : memref<4x8x128xf32, #tpu.memory_space<vmem>>, vector<1x8x128xf32>
    %43 = vector.shape_cast %42 : vector<1x8x128xf32> to vector<8x128xf32>
    %44 = vector.shape_cast %41 : vector<8x128xf32> to vector<1x8x128xf32>
    tpu.vector_store %arg5[%c1_21, %c0_22, %c0_23], %44 {strides = array<i32>} : memref<4x8x128xf32, #tpu.memory_space<vmem>>, vector<1x8x128xf32>,
    %c2 = arith.constant 2 : index
    %c0_24 = arith.constant 0 : index
    %c0_25 = arith.constant 0 : index
    %45 = vector.load %arg5[%c2, %c0_24, %c0_25] : memref<4x8x128xf32, #tpu.memory_space<vmem>>, vector<1x8x128xf32>
    %46 = vector.shape_cast %45 : vector<1x8x128xf32> to vector<8x128xf32>
    %47 = arith.addf %46, %4 : vector<8x128xf32>
    %c2_26 = arith.constant 2 : index
    %c0_27 = arith.constant 0 : index
    %c0_28 = arith.constant 0 : index
    %48 = vector.load %arg5[%c2_26, %c0_27, %c0_28] : memref<4x8x128xf32, #tpu.memory_space<vmem>>, vector<1x8x128xf32>
    %49 = vector.shape_cast %48 : vector<1x8x128xf32> to vector<8x128xf32>
    %50 = vector.shape_cast %47 : vector<8x128xf32> to vector<1x8x128xf32>
    tpu.vector_store %arg5[%c2_26, %c0_27, %c0_28], %50 {strides = array<i32>} : memref<4x8x128xf32, #tpu.memory_space<vmem>>, vector<1x8x128xf32>,
    %c3 = arith.constant 3 : index
    %c0_29 = arith.constant 0 : index
    %c0_30 = arith.constant 0 : index
    %51 = vector.load %arg5[%c3, %c0_29, %c0_30] : memref<4x8x128xf32, #tpu.memory_space<vmem>>, vector<1x8x128xf32>
    %52 = vector.shape_cast %51 : vector<1x8x128xf32> to vector<8x128xf32>
    %53 = arith.addf %52, %31 : vector<8x128xf32>
    %c3_31 = arith.constant 3 : index
    %c0_32 = arith.constant 0 : index
    %c0_33 = arith.constant 0 : index
    %54 = vector.load %arg5[%c3_31, %c0_32, %c0_33] : memref<4x8x128xf32, #tpu.memory_space<vmem>>, vector<1x8x128xf32>
    %55 = vector.shape_cast %54 : vector<1x8x128xf32> to vector<8x128xf32>
    %56 = vector.shape_cast %53 : vector<8x128xf32> to vector<1x8x128xf32>
    tpu.vector_store %arg5[%c3_31, %c0_32, %c0_33], %56 {strides = array<i32>} : memref<4x8x128xf32, #tpu.memory_space<vmem>>, vector<1x8x128xf32>,
    %c0_i32_34 = arith.constant 0 : i32
    %57 = arith.cmpi eq, %arg1, %c0_i32_34 : i32
    %58 = arith.extui %57 : i1 to i32
    %c0_i32_35 = arith.constant 0 : i32
    %59 = arith.cmpi ne, %58, %c0_i32_35 : i32
    scf.if %59 {
      %c0_36 = arith.constant 0 : index
      %c0_37 = arith.constant 0 : index
      %c0_38 = arith.constant 0 : index
      %60 = vector.load %arg5[%c0_36, %c0_37, %c0_38] : memref<4x8x128xf32, #tpu.memory_space<vmem>>, vector<1x8x128xf32>
      %61 = vector.shape_cast %60 : vector<1x8x128xf32> to vector<8x128xf32>
      %cst_39 = arith.constant dense<0.000000e+00> : vector<128xf32>
      %62 = vector.multi_reduction <add>, %61, %cst_39 [0] : vector<8x128xf32> to vector<128xf32>
      %c1_40 = arith.constant 1 : index
      %c0_41 = arith.constant 0 : index
      %c0_42 = arith.constant 0 : index
      %63 = vector.load %arg5[%c1_40, %c0_41, %c0_42] : memref<4x8x128xf32, #tpu.memory_space<vmem>>, vector<1x8x128xf32>
      %64 = vector.shape_cast %63 : vector<1x8x128xf32> to vector<8x128xf32>
      %cst_43 = arith.constant dense<0.000000e+00> : vector<128xf32>
      %65 = vector.multi_reduction <add>, %64, %cst_43 [0] : vector<8x128xf32> to vector<128xf32>
      %c2_44 = arith.constant 2 : index
      %c0_45 = arith.constant 0 : index
      %c0_46 = arith.constant 0 : index
      %66 = vector.load %arg5[%c2_44, %c0_45, %c0_46] : memref<4x8x128xf32, #tpu.memory_space<vmem>>, vector<1x8x128xf32>
      %67 = vector.shape_cast %66 : vector<1x8x128xf32> to vector<8x128xf32>
      %cst_47 = arith.constant dense<0.000000e+00> : vector<128xf32>
      %68 = vector.multi_reduction <add>, %67, %cst_47 [0] : vector<8x128xf32> to vector<128xf32>
      %c3_48 = arith.constant 3 : index
      %c0_49 = arith.constant 0 : index
      %c0_50 = arith.constant 0 : index
      %69 = vector.load %arg5[%c3_48, %c0_49, %c0_50] : memref<4x8x128xf32, #tpu.memory_space<vmem>>, vector<1x8x128xf32>
      %70 = vector.shape_cast %69 : vector<1x8x128xf32> to vector<8x128xf32>
      %cst_51 = arith.constant dense<0.000000e+00> : vector<128xf32>
      %71 = vector.multi_reduction <add>, %70, %cst_51 [0] : vector<8x128xf32> to vector<128xf32>
      %72 = vector.shape_cast %62 : vector<128xf32> to vector<1x128xf32>
      %73 = vector.shape_cast %65 : vector<128xf32> to vector<1x128xf32>
      %74 = vector.shape_cast %68 : vector<128xf32> to vector<1x128xf32>
      %75 = vector.shape_cast %71 : vector<128xf32> to vector<1x128xf32>
      %76 = tpu.concatenate %72, %73, %74, %75 in 0 : vector<1x128xf32>, vector<1x128xf32>, vector<1x128xf32>, vector<1x128xf32> -> vector<4x128xf32>
      %c0_52 = arith.constant 0 : index
      %c0_53 = arith.constant 0 : index
      %c0_54 = arith.constant 0 : index
      %77 = vector.load %arg4[%c0_52, %c0_53, %c0_54] : memref<1x4x128xf32, #tpu.memory_space<vmem>>, vector<1x4x128xf32>
      %78 = vector.shape_cast %77 : vector<1x4x128xf32> to vector<4x128xf32>
      %79 = vector.shape_cast %76 : vector<4x128xf32> to vector<1x4x128xf32>
      tpu.vector_store %arg4[%c0_52, %c0_53, %c0_54], %79 {strides = array<i32>} : memref<1x4x128xf32, #tpu.memory_space<vmem>>, vector<1x4x128xf32>,
    } else {
    }
    return
  }
  func.func @transform_0(%arg0: i32, %arg1: i32) -> (i32, i32) {
    %c1_i32 = arith.constant 1 : i32
    %0 = arith.muli %arg0, %c1_i32 : i32
    %1 = arith.addi %0, %arg1 : i32
    %c0_i32 = arith.constant 0 : i32
    %c0_i32_0 = arith.constant 0 : i32
    return %1, %c0_i32 : i32, i32
  }
  func.func @transform_1(%arg0: i32, %arg1: i32) -> (i32, i32) {
    %c1_i32 = arith.constant 1 : i32
    %0 = arith.muli %arg0, %c1_i32 : i32
    %1 = arith.addi %0, %arg1 : i32
    %c0_i32 = arith.constant 0 : i32
    %c0_i32_0 = arith.constant 0 : i32
    return %1, %c0_i32 : i32, i32
  }
  func.func @transform_2(%arg0: i32, %arg1: i32) -> (i32, i32, i32) {
    %c0_i32 = arith.constant 0 : i32
    %c0_i32_0 = arith.constant 0 : i32
    %c0_i32_1 = arith.constant 0 : i32
    return %arg0, %c0_i32, %c0_i32_0 : i32, i32, i32
  }
}

</mosaic_0001>

<bundles_post_ra>
// kernel: dice_bce_loss.1
= control target key start
LH: loop header
LB: loop body
LE: loop exit
PB: predicated region body
PF: predicated region fallthrough
CT: control target
= control target key end

     0   :  { %s416_s9 = smov 0   ;;  %s418_s10 = smov 0   ;;  %s456_s0 = inlined_call_operand.vmem [shape: f32[16,128], index: 0, kind: input, shape index: {}]   ;;  %s457_s1 = inlined_call_operand.vmem [shape: f32[16,128], index: 1, kind: input, shape index: {}]   ;;  %s458_s2 = inlined_call_operand.vmem [shape: f32[2,4,128], index: 2, kind: output, shape index: {}]  }
   0x1   :  { %s420_s11 = smov 0  }
   0x2 LB: > { %s24_s12 = sadd.s32 1, %s395_s10  ;;  %p341_p0 = scmp.ge.s32.totalorder %s399_s11, 1  ;;  %s399_s11 = sphi %s420_s11, %s12_s11   ;;  %s395_s10 = sphi %s418_s10, %s460_s10   ;;  %s391_s9 = sphi %s416_s9, %s459_s9  }
   0x3   : > { %p26_p1 = scmp.ge.s32.totalorder %s24_s12, 2  ;;  %p140_p2 = scmp.lt.s32.totalorder %s399_s11, 3 }
   0x5   : > { %s462_s12 = smov (%p26_p1, %s24_s12), 0  ;;  %p141_p3 = pnand %p341_p0, %p140_p2 }
   0x6   : > { %p167_p4 = scmp.lt.s32.totalorder (!%p141_p3), %s391_s9, 1 }
   0x7   : > { %144 = sbr.rel (%p141_p3) target bundleno = 64 (0x40), region = 28 }
   0xc   : > { %s464_s9 = smov (!%p167_p4, %s391_s9), 1  ;;  %vm257_vm1 = vcmask 1040384   ;;  %vm259_vm2 = vcmask 1041408   ;;  %vm261_vm3 = vcmask 1042432  }
   0xd   : > { %s342_s13 = sshll.u32 %s464_s9, 3  ;;  %s344_s20 = sshll.u32 %s464_s9, 2 }
   0xe   : > { %s170_s16 = scalar_lea.vmem %s456_s0, %s342_s13  ;;  %s176_s19 = scalar_lea.vmem %s457_s1, %s342_s13 }
   0xf   : > { %v190_v0 = vld [vmem:[%s170_s16] sm:$0xff]  ;;  %s181_s23 = scalar_lea.vmem %s458_s2, %s344_s20 }
  0x10   : > { %v192_v1 = vsub.f32 0.0, %v190_v0  ;;  %v191_v5 = vld [vmem:[%s176_s19] sm:$0xff]  ;;  %vm203_vm0 = vcmp.lt.f32.partialorder %v190_v0, -88.0 }
  0x11   : > { %v244_v7 = vrot.slane %v191_v5, 4  ;;  %v206_v17 = vsub.f32 1.0, %v191_v5 }
  0x12   : > { %v193_v2 = vmul.f32 1.442695, %v192_v1 }
  0x13   : > { %v245_v16 = vadd.f32 %v244_v7, %v191_v5 }
  0x14   : > { %371 = vpow2.f32 %v193_v2 }
  0x15   : > { %v246_v25 = vrot.slane %v245_v16, 2 }
  0x17   : > { %v247_v30 = vadd.f32 %v246_v25, %v245_v16 }
  0x19   : > { %v248_v35 = vrot.slane %v247_v30, 1 }
  0x1a   : > { %v372_v3 = vpop.eup %371 }
  0x1b   : > { %v195_v4 = vadd.f32 1.0, %v372_v3  ;;  %v249_v40 = vadd.f32 %v248_v35, %v247_v30 }
  0x1d   : > { %373 = vrcp.f32 %v195_v4 }
  0x1e   : > { %375 = vlog2.f32 %v195_v4 }
  0x23   : > { %v374_v6 = vpop.eup %373 }
  0x24   : > { %v376_v8 = vpop.eup %375  ;;  %v210_v9 = vmul.f32 %v374_v6, %v191_v5  ;;  %v237_v10 = vrot.slane %v374_v6, 4 }
  0x25   : > { %v198_v11 = vmul.f32 0.6931472, %v376_v8 }
  0x26   : > { %v230_v12 = vrot.slane %v210_v9, 4  ;;  %v238_v13 = vadd.f32 %v374_v6, %v237_v10 }
  0x27   : > { %v199_v14 = vsub.f32 0.0, %v198_v11  ;;  %v201_v15 = vsub.f32 %v192_v1, %v198_v11 }
  0x28   : > { %v231_v18 = vadd.f32 %v230_v12, %v210_v9  ;;  %v239_v19 = vrot.slane %v238_v13, 2 }
  0x29   : > { %v200_v20 = vmax.f32 %v199_v14, -100.0  ;;  %v202_v21 = vmax.f32 %v201_v15, -100.0 }
  0x2a   : > { %v232_v22 = vrot.slane %v231_v18, 2  ;;  %v240_v28 = vadd.f32 %v239_v19, %v238_v13 }
  0x2b   : > { %v204_v23 = vsel %vm203_vm0, 0.0, %v202_v21  ;;  %v205_v24 = vmul.f32 %v200_v20, %v191_v5 }
  0x2c   : > { %v207_v26 = vmul.f32 %v206_v17, %v204_v23  ;;  %v233_v27 = vadd.f32 %v232_v22, %v231_v18  ;;  %v241_v33 = vrot.slane %v240_v28, 1 }
  0x2e   : > { %v208_v29 = vadd.f32 %v207_v26, %v205_v24  ;;  %v234_v32 = vrot.slane %v233_v27, 1  ;;  %v242_v37 = vadd.f32 %v241_v33, %v240_v28 }
  0x30   : > { %v209_v31 = vsub.f32 0.0, %v208_v29  ;;  %v235_v36 = vadd.f32 %v234_v32, %v233_v27 }
  0x32   : > { %v251_v34 = vrot.slane %v209_v31, 4  ;;  %v258_v42 = vsel %vm257_vm1, %v235_v36, %v242_v37 }
  0x33   : > { %v260_v44 = vsel %vm259_vm2, %v258_v42, %v249_v40 }
  0x34   : > { %v252_v38 = vadd.f32 %v251_v34, %v209_v31 }
  0x36   : > { %v253_v39 = vrot.slane %v252_v38, 2 }
  0x38   : > { %v254_v41 = vadd.f32 %v253_v39, %v252_v38 }
  0x3a   : > { %v255_v43 = vrot.slane %v254_v41, 1 }
  0x3c   : > { %v256_v45 = vadd.f32 %v255_v43, %v254_v41 }
  0x3e   : > { %v262_v46 = vsel %vm261_vm3, %v260_v44, %v256_v45 }
  0x3f   : > { %263 = vst [vmem:[%s181_s23] sm:$0xf] %v262_v46 }
  0x40 PF: > { %s12_s11 = sadd.s32 1, %s399_s11   ;;  %s459_s9 = smov %s395_s10 }
  0x41   : > { %p9_p5 = scmp.ge.s32.totalorder %s12_s11, 4   ;;  %s460_s10 = smov %s462_s12 }
  0x43   :  { %11 = sbr.rel (!%p9_p5) target bundleno = 2 (0x2), region = 72 }

</bundles_post_ra>
